<compile_context>
chip_gen: v6e
topology: v6e:2x2x1
jax: 0.10.0
libtpu: 0.0.40
codegen_flags: <defaults>
</compile_context>

<pallas_src>
import jax
import jax.numpy as jnp
from jax.experimental import pallas as pl
from jax.experimental.pallas import tpu as pltpu


# --------------------------------------------------------------------------
# Kernel 1: scale/shift = SiLU(emb) @ W^T + b   (computed exactly once)
# --------------------------------------------------------------------------
def film_params_kernel(emb_ref, ws_ref, wsh_ref, bs_ref, bsh_ref,
                       scale_ref, shift_ref):
    emb = emb_ref[...].astype(jnp.float32)                     # (B, E)
    silu = emb * jax.nn.sigmoid(emb)                           # SiLU on VPU/EUP
    scale = jnp.dot(silu, ws_ref[...].astype(jnp.float32),
                    preferred_element_type=jnp.float32)        # (B, H) MXU
    shift = jnp.dot(silu, wsh_ref[...].astype(jnp.float32),
                    preferred_element_type=jnp.float32)        # (B, H) MXU
    scale_ref[...] = scale + bs_ref[...].astype(jnp.float32)
    shift_ref[...] = shift + bsh_ref[...].astype(jnp.float32)


# --------------------------------------------------------------------------
# Kernel 2: out = scale * x + shift   (broadcast FMA over lane-dense T tiles)
# --------------------------------------------------------------------------
def film_modulate_kernel(scale_ref, shift_ref, x_ref, o_ref):
    x = x_ref[...]                                             # (B*H, tT)
    scale = scale_ref[...].astype(x.dtype)                     # (B*H, 1)
    shift = shift_ref[...].astype(x.dtype)                     # (B*H, 1)
    o_ref[...] = (scale * x + shift).astype(o_ref.dtype)


def _choose_t_tile(rows, T, dtype_bytes, t_tile=None):
    """Pick a large, lane-dense T tile that fits a conservative VMEM budget."""
    if t_tile is not None:
        assert T % t_tile == 0
        return t_tile
    if T % 128 != 0:
        return T                                   # single full-T block
    # x-in + out, double-buffered: 4 copies of (rows, tile) must fit the budget.
    budget = 12 * 1024 * 1024                      # safe under v5e's 16 MiB scoped default
    max_t_elems = max(128, budget // (4 * rows * dtype_bytes))
    tile = (min(T, 2048) // 128) * 128
    while tile > 128 and (T % tile != 0 or tile > max_t_elems):
        tile -= 128
    # keep >=2 parallel grid steps for megacore when T allows it
    if T // tile < 2 and T >= 256 and (T // 2) % 128 == 0 and (T // 2) <= max_t_elems:
        tile = T // 2
    return tile


def film_forward(x, sigma_emb, w, b, *, t_tile=None):
    """x: (B, H, T), sigma_emb: (B, E), w: (2H, E) torch convention, b: (2H,)."""
    B, H, T = x.shape
    E = sigma_emb.shape[-1]
    assert w.shape == (2 * H, E) and b.shape == (2 * H,)

    # Parameter prep (glue): split linear into scale/shift halves, transpose.
    ws_t = jnp.transpose(w[:H, :])                 # (E, H)
    wsh_t = jnp.transpose(w[H:, :])                # (E, H)
    bs = b[:H].reshape(1, H)
    bsh = b[H:].reshape(1, H)

    # ---- one-shot params kernel -------------------------------------------
    scale, shift = pl.pallas_call(
        film_params_kernel,
        out_shape=(jax.ShapeDtypeStruct((B, H), jnp.float32),
                   jax.ShapeDtypeStruct((B, H), jnp.float32)),
        grid_spec=pltpu.PrefetchScalarGridSpec(
            num_scalar_prefetch=0,
            grid=(1,),
            in_specs=[
                pl.BlockSpec((B, E), lambda i: (0, 0)),      # sigma_emb
                pl.BlockSpec((E, H), lambda i: (0, 0)),      # W_scale^T
                pl.BlockSpec((E, H), lambda i: (0, 0)),      # W_shift^T
                pl.BlockSpec((1, H), lambda i: (0, 0)),      # b_scale
                pl.BlockSpec((1, H), lambda i: (0, 0)),      # b_shift
            ],
            out_specs=[pl.BlockSpec((B, H), lambda i: (0, 0)),
                       pl.BlockSpec((B, H), lambda i: (0, 0))]),
        compiler_params=pltpu.CompilerParams(
            dimension_semantics=("arbitrary",)),
    )(sigma_emb, ws_t, wsh_t, bs, bsh)

    # Collapse (B, H, T) -> (B*H, T): free contiguous reshape; gives the FMA
    # kernel clean 2-D tiles (rows on sublanes, lane-dense T on lanes).
    rows = B * H
    x2 = x.reshape(rows, T)
    scale2 = scale.reshape(rows, 1)
    shift2 = shift.reshape(rows, 1)

    # ---- modulation kernel: large lane-dense T tiles, parallel grid ---------
    tt = _choose_t_tile(rows, T, jnp.dtype(x.dtype).itemsize, t_tile)
    grid = (T // tt,)
    out2 = pl.pallas_call(
        film_modulate_kernel,
        out_shape=jax.ShapeDtypeStruct((rows, T), x.dtype),
        grid_spec=pltpu.PrefetchScalarGridSpec(
            num_scalar_prefetch=0,
            grid=grid,
            in_specs=[
                pl.BlockSpec((rows, 1), lambda t: (0, 0)),    # scale (resident)
                pl.BlockSpec((rows, 1), lambda t: (0, 0)),    # shift (resident)
                pl.BlockSpec((rows, tt), lambda t: (0, t)),   # x tile
            ],
            out_specs=pl.BlockSpec((rows, tt), lambda t: (0, t)),
        ),
        compiler_params=pltpu.CompilerParams(
            dimension_semantics=("parallel",)),
    )(scale2, shift2, x2)
    return out2.reshape(B, H, T)


def film_reference(x, sigma_emb, w, b):
    silu = sigma_emb * jax.nn.sigmoid(sigma_emb)
    h = silu @ w.T + b                              # (B, 2H)
    H = x.shape[1]
    scale, shift = h[:, :H], h[:, H:]
    return scale[:, :, None] * x + shift[:, :, None]


if __name__ == "__main__":
    B, H, T = 2, 32, 128
    E = 256  # embedding_size default in the module

    key = jax.random.PRNGKey(0)
    kx, ke, kw, kb = jax.random.split(key, 4)

    x = jax.random.normal(kx, (B, H, T), dtype=jnp.float32)
    sigma_emb = jax.random.normal(ke, (B, E), dtype=jnp.float32)

    # Deterministic synthetic Linear(E -> 2H) params (torch weight convention).
    bound = 1.0 / (E ** 0.5)
    w = jax.random.uniform(kw, (2 * H, E), minval=-bound, maxval=bound,
                           dtype=jnp.float32)
    b = jax.random.uniform(kb, (2 * H,), minval=-bound, maxval=bound,
                           dtype=jnp.float32)

    out = film_forward(x, sigma_emb, w, b)
    jax.block_until_ready(out)

    ref = film_reference(x, sigma_emb, w, b)
    assert out.shape == (B, H, T)
    assert jnp.allclose(out, ref, atol=1e-4, rtol=1e-4), "mismatch vs reference"

    print("KERNEL_OK")
</pallas_src>

<mosaic_0001>
module attributes {stable_mosaic.version = 11 : i64} {
  func.func @film_params_kernel(%arg0: i32, %arg1: memref<2x256xf32, #tpu.memory_space<vmem>>, %arg2: memref<256x32xf32, #tpu.memory_space<vmem>>, %arg3: memref<256x32xf32, #tpu.memory_space<vmem>>, %arg4: memref<1x32xf32, #tpu.memory_space<vmem>>, %arg5: memref<1x32xf32, #tpu.memory_space<vmem>>, %arg6: memref<2x32xf32, #tpu.memory_space<vmem>>, %arg7: memref<2x32xf32, #tpu.memory_space<vmem>>) attributes {dimension_semantics = [#tpu.dimension_semantics<arbitrary>], iteration_bounds = array<i64: 1>, scalar_prefetch = 0 : i64, scratch_operands = 0 : i64, tpu.core_type = #tpu.core_type<tc>, window_params = [{pipeline_mode = #tpu.pipeline_mode<synchronous>, transform_indices = @transform_0, window_bounds = array<i64: 2, 256>}, {pipeline_mode = #tpu.pipeline_mode<synchronous>, transform_indices = @transform_1, window_bounds = array<i64: 256, 32>}, {pipeline_mode = #tpu.pipeline_mode<synchronous>, transform_indices = @transform_2, window_bounds = array<i64: 256, 32>}, {pipeline_mode = #tpu.pipeline_mode<synchronous>, transform_indices = @transform_3, window_bounds = array<i64: 1, 32>}, {pipeline_mode = #tpu.pipeline_mode<synchronous>, transform_indices = @transform_4, window_bounds = array<i64: 1, 32>}, {pipeline_mode = #tpu.pipeline_mode<synchronous>, transform_indices = @transform_5, window_bounds = array<i64: 2, 32>}, {pipeline_mode = #tpu.pipeline_mode<synchronous>, transform_indices = @transform_6, window_bounds = array<i64: 2, 32>}]} {
    %c0 = arith.constant 0 : index
    %c0_0 = arith.constant 0 : index
    %0 = vector.load %arg1[%c0, %c0_0] : memref<2x256xf32, #tpu.memory_space<vmem>>, vector<2x256xf32>
    %1 = arith.negf %0 : vector<2x256xf32>
    %2 = math.exp %1 : vector<2x256xf32>
    %cst = arith.constant 1.000000e+00 : f32
    %3 = vector.broadcast %cst : f32 to vector<2x256xf32>
    %4 = arith.addf %3, %2 : vector<2x256xf32>
    %5 = arith.divf %3, %4 : vector<2x256xf32>
    %6 = arith.mulf %0, %5 : vector<2x256xf32>
    %c0_1 = arith.constant 0 : index
    %c0_2 = arith.constant 0 : index
    %7 = vector.load %arg2[%c0_1, %c0_2] : memref<256x32xf32, #tpu.memory_space<vmem>>, vector<256x32xf32>
    %cst_3 = arith.constant dense<0.000000e+00> : vector<2x32xf32>
    %8 = tpu.matmul %6, %7, %cst_3 {dimension_numbers = #tpu.dot_dimension_numbers<[1], [0], [0], [1], [0, 0, 1, 1], [], []>} : vector<2x256xf32>, vector<256x32xf32>, vector<2x32xf32> -> vector<2x32xf32>
    %c0_4 = arith.constant 0 : index
    %c0_5 = arith.constant 0 : index
    %9 = vector.load %arg3[%c0_4, %c0_5] : memref<256x32xf32, #tpu.memory_space<vmem>>, vector<256x32xf32>
    %cst_6 = arith.constant dense<0.000000e+00> : vector<2x32xf32>
    %10 = tpu.matmul %6, %9, %cst_6 {dimension_numbers = #tpu.dot_dimension_numbers<[1], [0], [0], [1], [0, 0, 1, 1], [], []>} : vector<2x256xf32>, vector<256x32xf32>, vector<2x32xf32> -> vector<2x32xf32>
    %c0_7 = arith.constant 0 : index
    %c0_8 = arith.constant 0 : index
    %11 = vector.load %arg4[%c0_7, %c0_8] : memref<1x32xf32, #tpu.memory_space<vmem>>, vector<1x32xf32>
    %12 = vector.broadcast %11 : vector<1x32xf32> to vector<2x32xf32>
    %13 = arith.addf %8, %12 : vector<2x32xf32>
    %c0_9 = arith.constant 0 : index
    %c0_10 = arith.constant 0 : index
    %14 = vector.load %arg6[%c0_9, %c0_10] : memref<2x32xf32, #tpu.memory_space<vmem>>, vector<2x32xf32>
    tpu.vector_store %arg6[%c0_9, %c0_10], %13 {strides = array<i32>} : memref<2x32xf32, #tpu.memory_space<vmem>>, vector<2x32xf32>,
    %c0_11 = arith.constant 0 : index
    %c0_12 = arith.constant 0 : index
    %15 = vector.load %arg5[%c0_11, %c0_12] : memref<1x32xf32, #tpu.memory_space<vmem>>, vector<1x32xf32>
    %16 = vector.broadcast %15 : vector<1x32xf32> to vector<2x32xf32>
    %17 = arith.addf %10, %16 : vector<2x32xf32>
    %c0_13 = arith.constant 0 : index
    %c0_14 = arith.constant 0 : index
    %18 = vector.load %arg7[%c0_13, %c0_14] : memref<2x32xf32, #tpu.memory_space<vmem>>, vector<2x32xf32>
    tpu.vector_store %arg7[%c0_13, %c0_14], %17 {strides = array<i32>} : memref<2x32xf32, #tpu.memory_space<vmem>>, vector<2x32xf32>,
    return
  }
  func.func @transform_0(%arg0: i32) -> (i32, i32) {
    %c0_i32 = arith.constant 0 : i32
    %c0_i32_0 = arith.constant 0 : i32
    %c0_i32_1 = arith.constant 0 : i32
    return %c0_i32, %c0_i32_0 : i32, i32
  }
  func.func @transform_1(%arg0: i32) -> (i32, i32) {
    %c0_i32 = arith.constant 0 : i32
    %c0_i32_0 = arith.constant 0 : i32
    %c0_i32_1 = arith.constant 0 : i32
    return %c0_i32, %c0_i32_0 : i32, i32
  }
  func.func @transform_2(%arg0: i32) -> (i32, i32) {
    %c0_i32 = arith.constant 0 : i32
    %c0_i32_0 = arith.constant 0 : i32
    %c0_i32_1 = arith.constant 0 : i32
    return %c0_i32, %c0_i32_0 : i32, i32
  }
  func.func @transform_3(%arg0: i32) -> (i32, i32) {
    %c0_i32 = arith.constant 0 : i32
    %c0_i32_0 = arith.constant 0 : i32
    %c0_i32_1 = arith.constant 0 : i32
    return %c0_i32, %c0_i32_0 : i32, i32
  }
  func.func @transform_4(%arg0: i32) -> (i32, i32) {
    %c0_i32 = arith.constant 0 : i32
    %c0_i32_0 = arith.constant 0 : i32
    %c0_i32_1 = arith.constant 0 : i32
    return %c0_i32, %c0_i32_0 : i32, i32
  }
  func.func @transform_5(%arg0: i32) -> (i32, i32) {
    %c0_i32 = arith.constant 0 : i32
    %c0_i32_0 = arith.constant 0 : i32
    %c0_i32_1 = arith.constant 0 : i32
    return %c0_i32, %c0_i32_0 : i32, i32
  }
  func.func @transform_6(%arg0: i32) -> (i32, i32) {
    %c0_i32 = arith.constant 0 : i32
    %c0_i32_0 = arith.constant 0 : i32
    %c0_i32_1 = arith.constant 0 : i32
    return %c0_i32, %c0_i32_0 : i32, i32
  }
}

</mosaic_0001>

<bundles_post_ra>
// kernel: tpu_custom_call.1
= control target key start
LH: loop header
LB: loop body
LE: loop exit
PB: predicated region body
PF: predicated region fallthrough
CT: control target
= control target key end

     0   :  { %12 = vsyncpa [#allocation3], 0  ;;  %s661_s0 = inlined_call_operand.vmem [shape: f32[2,256], index: 0, kind: input, shape index: {}]   ;;  %s662_s1 = inlined_call_operand.vmem [shape: f32[256,32], index: 1, kind: input, shape index: {}]   ;;  %s663_s2 = inlined_call_operand.vmem [shape: f32[256,32], index: 2, kind: input, shape index: {}]   ;;  %s664_s3 = inlined_call_operand.vmem [shape: f32[1,32], index: 3, kind: input, shape index: {}]   ;;  %s665_s4 = inlined_call_operand.vmem [shape: f32[1,32], index: 4, kind: input, shape index: {}]   ;;  %s666_s5 = inlined_call_operand.hbm [shape: f32[2,32], index: 5, kind: output, shape index: {0}]   ;;  %s667_s6 = inlined_call_operand.hbm [shape: f32[2,32], index: 6, kind: output, shape index: {1}]  }
   0x1   :  { %v63_v0 = vld [vmem:[%s662_s1 + $0xf8] sm:$0xff]  ;;  %v62_v4 = vld [vmem:[%s662_s1 + $0xf0] sm:$0xff]  ;;  %v61_v8 = vld [vmem:[%s662_s1 + $0xe8] sm:$0xff] }
   0x2   :  { %v95_v1 = vld [vmem:[%s663_s2 + $0xf8] sm:$0xff]  ;;  %295 = vmatprep.subr.mxu0 %v63_v0  ;;  %v94_v5 = vld [vmem:[%s663_s2 + $0xf0] sm:$0xff]  ;;  %v93_v9 = vld [vmem:[%s663_s2 + $0xe8] sm:$0xff] }
   0x3   :  { %v47_v2 = vld [vmem:[%s662_s1 + $0x78] sm:$0xff]  ;;  %330 = vmatprep.subr.mxu1 %v95_v1  ;;  %v46_v6 = vld [vmem:[%s662_s1 + $0x70] sm:$0xff]  ;;  %v45_v10 = vld [vmem:[%s662_s1 + $0x68] sm:$0xff] }
   0x4   :  { %v79_v3 = vld [vmem:[%s663_s2 + $0x78] sm:$0xff]  ;;  %296 = vmatpush3.msra.mxu0 %v47_v2  ;;  %v78_v7 = vld [vmem:[%s663_s2 + $0x70] sm:$0xff]  ;;  %v77_v11 = vld [vmem:[%s663_s2 + $0x68] sm:$0xff] }
   0x5   :  { %331 = vmatpush3.msra.mxu1 %v79_v3  ;;  %297 = vmatprep.subr.mxu0 %v62_v4  ;;  %v60_v12 = vld [vmem:[%s662_s1 + $0xe0] sm:$0xff]  ;;  %v59_v16 = vld [vmem:[%s662_s1 + $0xd8] sm:$0xff]  ;;  %v58_v20 = vld [vmem:[%s662_s1 + $0xd0] sm:$0xff] }
   0x6   :  { %332 = vmatprep.subr.mxu1 %v94_v5  ;;  %298 = vmatpush3.msra.mxu0 %v46_v6  ;;  %v92_v13 = vld [vmem:[%s663_s2 + $0xe0] sm:$0xff]  ;;  %v91_v17 = vld [vmem:[%s663_s2 + $0xd8] sm:$0xff]  ;;  %v90_v21 = vld [vmem:[%s663_s2 + $0xd0] sm:$0xff] }
   0x7   :  { %333 = vmatpush3.msra.mxu1 %v78_v7  ;;  %299 = vmatprep.subr.mxu0 %v61_v8  ;;  %v44_v14 = vld [vmem:[%s662_s1 + $0x60] sm:$0xff]  ;;  %v43_v18 = vld [vmem:[%s662_s1 + $0x58] sm:$0xff]  ;;  %v42_v22 = vld [vmem:[%s662_s1 + $0x50] sm:$0xff] }
   0x8   :  { %334 = vmatprep.subr.mxu1 %v93_v9  ;;  %v76_v15 = vld [vmem:[%s663_s2 + $0x60] sm:$0xff]  ;;  %300 = vmatpush3.msra.mxu0 %v45_v10  ;;  %v75_v19 = vld [vmem:[%s663_s2 + $0x58] sm:$0xff]  ;;  %v74_v23 = vld [vmem:[%s663_s2 + $0x50] sm:$0xff] }
   0x9   :  { %335 = vmatpush3.msra.mxu1 %v77_v11  ;;  %301 = vmatprep.subr.mxu0 %v60_v12  ;;  %v57_v24 = vld [vmem:[%s662_s1 + $0xc8] sm:$0xff]  ;;  %v56_v28 = vld [vmem:[%s662_s1 + $0xc0] sm:$0xff]  ;;  %v55_v32 = vld [vmem:[%s662_s1 + $0xb8] sm:$0xff] }
   0xa   :  { %336 = vmatprep.subr.mxu1 %v92_v13  ;;  %302 = vmatpush3.msra.mxu0 %v44_v14  ;;  %v89_v25 = vld [vmem:[%s663_s2 + $0xc8] sm:$0xff]  ;;  %v88_v29 = vld [vmem:[%s663_s2 + $0xc0] sm:$0xff]  ;;  %v87_v33 = vld [vmem:[%s663_s2 + $0xb8] sm:$0xff] }
   0xb   :  { %337 = vmatpush3.msra.mxu1 %v76_v15  ;;  %303 = vmatprep.subr.mxu0 %v59_v16  ;;  %v41_v26 = vld [vmem:[%s662_s1 + $0x48] sm:$0xff]  ;;  %v40_v30 = vld [vmem:[%s662_s1 + $0x40] sm:$0xff]  ;;  %v39_v34 = vld [vmem:[%s662_s1 + $0x38] sm:$0xff] }
   0xc   :  { %338 = vmatprep.subr.mxu1 %v91_v17  ;;  %304 = vmatpush3.msra.mxu0 %v43_v18  ;;  %v73_v27 = vld [vmem:[%s663_s2 + $0x48] sm:$0xff]  ;;  %v72_v31 = vld [vmem:[%s663_s2 + $0x40] sm:$0xff]  ;;  %v71_v35 = vld [vmem:[%s663_s2 + $0x38] sm:$0xff] }
   0xd   :  { %339 = vmatpush3.msra.mxu1 %v75_v19  ;;  %305 = vmatprep.subr.mxu0 %v58_v20  ;;  %v54_v36 = vld [vmem:[%s662_s1 + $0xb0] sm:$0xff]  ;;  %v53_v40 = vld [vmem:[%s662_s1 + $0xa8] sm:$0xff]  ;;  %v52_v44 = vld [vmem:[%s662_s1 + $0xa0] sm:$0xff] }
   0xe   :  { %340 = vmatprep.subr.mxu1 %v90_v21  ;;  %306 = vmatpush3.msra.mxu0 %v42_v22  ;;  %v86_v37 = vld [vmem:[%s663_s2 + $0xb0] sm:$0xff]  ;;  %v85_v41 = vld [vmem:[%s663_s2 + $0xa8] sm:$0xff]  ;;  %v84_v45 = vld [vmem:[%s663_s2 + $0xa0] sm:$0xff] }
   0xf   :  { %341 = vmatpush3.msra.mxu1 %v74_v23  ;;  %307 = vmatprep.subr.mxu0 %v57_v24  ;;  %v38_v38 = vld [vmem:[%s662_s1 + $0x30] sm:$0xff]  ;;  %v37_v42 = vld [vmem:[%s662_s1 + $0x28] sm:$0xff]  ;;  %v36_v46 = vld [vmem:[%s662_s1 + $0x20] sm:$0xff] }
  0x10   :  { %342 = vmatprep.subr.mxu1 %v89_v25  ;;  %308 = vmatpush3.msra.mxu0 %v41_v26  ;;  %v70_v39 = vld [vmem:[%s663_s2 + $0x30] sm:$0xff]  ;;  %v69_v43 = vld [vmem:[%s663_s2 + $0x28] sm:$0xff]  ;;  %v68_v47 = vld [vmem:[%s663_s2 + $0x20] sm:$0xff] }
  0x11   :  { %343 = vmatpush3.msra.mxu1 %v73_v27  ;;  %309 = vmatprep.subr.mxu0 %v56_v28  ;;  %v24_v48 = vld [vmem:[%s661_s0] sm:$0xf] }
  0x12   :  { %344 = vmatprep.subr.mxu1 %v88_v29  ;;  %310 = vmatpush3.msra.mxu0 %v40_v30 }
  0x13   :  { %345 = vmatpush3.msra.mxu1 %v72_v31  ;;  %311 = vmatprep.subr.mxu0 %v55_v32 }
  0x14   :  { %346 = vmatprep.subr.mxu1 %v87_v33  ;;  %312 = vmatpush3.msra.mxu0 %v39_v34 }
  0x15   :  { %347 = vmatpush3.msra.mxu1 %v71_v35  ;;  %313 = vmatprep.subr.mxu0 %v54_v36 }
  0x16   :  { %348 = vmatprep.subr.mxu1 %v86_v37  ;;  %314 = vmatpush3.msra.mxu0 %v38_v38 }
  0x17   :  { %349 = vmatpush3.msra.mxu1 %v70_v39  ;;  %315 = vmatprep.subr.mxu0 %v53_v40 }
  0x18   :  { %350 = vmatprep.subr.mxu1 %v85_v41 }
  0x19   :  { %13 = vsyncpa [#allocation5], 0  ;;  %316 = vmatpush3.msra.mxu0 %v37_v42  ;;  %351 = vmatpush3.msra.mxu1 %v69_v43  ;;  %v51_v49 = vld [vmem:[%s662_s1 + $0x98] sm:$0xff]  ;;  %v292_v51 = vmul.f32 -1.442695, %v24_v48  ;;  %v50_v54 = vld [vmem:[%s662_s1 + $0x90] sm:$0xff]  ;;  %v107_v6 = vlaneseq }
  0x1a   :  { %v83_v50 = vld [vmem:[%s663_s2 + $0x98] sm:$0xff]  ;;  %317 = vmatprep.subr.mxu0 %v52_v44  ;;  %352 = vmatprep.subr.mxu1 %v84_v45  ;;  %v82_v55 = vld [vmem:[%s663_s2 + $0x90] sm:$0xff]  ;;  %v49_v58 = vld [vmem:[%s662_s1 + $0x88] sm:$0xff]  ;;  %v416_v4 = vmov 1983009808   ;;  %s417_s7 = smov [#allocation2]  }
  0x1b   :  { %v35_v52 = vld [vmem:[%s662_s1 + $0x18] sm:$0xff]  ;;  %318 = vmatpush3.msra.mxu0 %v36_v46  ;;  %353 = vmatpush3.msra.mxu1 %v68_v47  ;;  %368 = vpow2.f32 %v292_v51  ;;  %v34_v56 = vld [vmem:[%s662_s1 + $0x10] sm:$0xff]  ;;  %v81_v59 = vld [vmem:[%s663_s2 + $0x88] sm:$0xff]  ;;  %v105_v5 = vunpack.c.l.s4 %v416_v4  ;;  %v108_v8 = vshrl.u32 %v107_v6, 7  ;;  %s270_s8 = sshll.u32 %s417_s7, 4  ;;  %s418_s9 = smov [#allocation4]   ;;  %s271_s8 = int_to_ptr.vmem [resolvable:$true] %s270_s8 }
  0x1c   :  { %v67_v53 = vld [vmem:[%s663_s2 + $0x18] sm:$0xff]  ;;  %319 = vmatprep.subr.mxu0 %v51_v49  ;;  %354 = vmatprep.subr.mxu1 %v83_v50  ;;  %v66_v57 = vld [vmem:[%s663_s2 + $0x10] sm:$0xff]  ;;  %v33_v60 = vld [vmem:[%s662_s1 + $0x8] sm:$0xff]  ;;  %s280_s10 = sshll.u32 %s418_s9, 4  ;;  %vm184_vm0 = vcmask 254976   ;;  %s372_s11 = scalar_lea.vmem %s271_s8, 32  ;;  %s281_s10 = int_to_ptr.vmem [resolvable:$true] %s280_s10 }
  0x1d   :  { %320 = vmatpush3.msra.mxu0 %v35_v52  ;;  %355 = vmatpush3.msra.mxu1 %v67_v53  ;;  %v65_v61 = vld [vmem:[%s663_s2 + $0x8] sm:$0xff]  ;;  %v48_v62 = vld [vmem:[%s662_s1 + $0x80] sm:$0xff]  ;;  %v106_v7 = vunpack.c.0.s8 %v105_v5  ;;  %p373_p0 = scmp.ne.s32.totalorder %s271_s8, %s372_s11  ;;  %p377_p1 = scmp.lt.s32.totalorder %s271_s8, %s271_s8 }
  0x1e   :  { %321 = vmatprep.subr.mxu0 %v50_v54  ;;  %356 = vmatprep.subr.mxu1 %v82_v55  ;;  %v80_v63 = vld [vmem:[%s663_s2 + $0x80] sm:$0xff]  ;;  %p378_p2 = scmp.lt.s32.totalorder %s372_s11, %s372_s11 }
  0x1f   :  { %322 = vmatpush3.msra.mxu0 %v34_v56  ;;  %357 = vmatpush3.msra.mxu1 %v66_v57  ;;  %v32_v0 = vld [vmem:[%s662_s1] sm:$0xff]  ;;  %v109_v9 = vsub.s32 %v106_v7, %v108_v8 }
  0x20   :  { %323 = vmatprep.subr.mxu0 %v49_v58  ;;  %358 = vmatprep.subr.mxu1 %v81_v59  ;;  %v64_v1 = vld [vmem:[%s663_s2] sm:$0xff]  ;;  %p379_p3 = por %p378_p2, %p377_p1 }
  0x21   :  { %324 = vmatpush3.msra.mxu0 %v33_v60  ;;  %359 = vmatpush3.msra.mxu1 %v65_v61  ;;  %v294_v17 = vld [vmem:[%s665_s4] ss:$0 sm:$0xff] }
  0x22   :  { %325 = vmatprep.subr.mxu0 %v48_v62  ;;  %360 = vmatprep.subr.mxu1 %v80_v63  ;;  %v293_v19 = vld [vmem:[%s664_s3] ss:$0 sm:$0xff]  ;;  %p380_p4 = pnand %p379_p3, %p373_p0 }
  0x23   :  { %326 = vmatpush3.msra.mxu0 %v32_v0  ;;  %361 = vmatpush3.msra.mxu1 %v64_v1 }
  0x28   :  { %v369_v2 = vpop.eup %368 }
  0x29   :  { %v28_v3 = vadd.f32 1.0, %v369_v2 }
  0x2b   :  { %370 = vrcp.f32 %v28_v3 }
  0x38   :  { %v371_v10 = vpop.eup %370 }
  0x39   :  { %v31_v11 = vmul.f32 %v371_v10, %v24_v48 }
  0x3b   :  { %v110_v12 = vrot.slane %v31_v11, %v109_v9 }
  0x3d   :  { %v111_v13 = vcombine.high %v110_v12, %v110_v12 }
  0x3f   :  { %178 = vmatprep.mubr.f32.mxu0 %v111_v13  ;;  %257 = vmatprep.mubr.f32.mxu1 %v111_v13 }
  0x40   :  { %179 = vmatmul.mubr.f32.vlgmr.msra.gmra.mxu0 %v110_v12  ;;  %258 = vmatmul.mubr.f32.vlgmr.msra.gmra.mxu1 %v110_v12 }
 0x100   :  { %v327_v14 = vpop.f32.mrf.mxu0  ;;  %v362_v15 = vpop.f32.mrf.mxu1 }
 0x102   :  { %v328_v16 = vpop.f32.mrf.mxu0  ;;  %v363_v18 = vpop.f32.mrf.mxu1 }
 0x103   :  { %v329_v20 = vadd.f32 %v328_v16, %v327_v14  ;;  %v364_v21 = vadd.f32 %v363_v18, %v362_v15 }
 0x105   :  { %v260_v22 = vadd.f32 %v364_v21, %v294_v17  ;;  %v181_v23 = vadd.f32 %v329_v20, %v293_v19 }
 0x107   :  { %185 = vst.msk [vmem:[#allocation2] sm:$0x3] %vm184_vm0, %v181_v23  ;;  %263 = vst.msk [vmem:[#allocation4] sm:$0x3] %vm184_vm0, %v260_v22 }
 0x108   :  { %383 = shalt.err (!%p380_p4)
}
 0x109   :  { %273 = dma.vmem_to_hbm [thread:$0]  %s271_s8, 32, %s666_s5, [#allocation3]  }
 0x10a   :  { %s392_s12 = scalar_lea.vmem %s281_s10, 32  ;;  %p397_p6 = scmp.lt.s32.totalorder %s281_s10, %s281_s10 }
 0x10b   :  { %p393_p5 = scmp.ne.s32.totalorder %s281_s10, %s392_s12  ;;  %p398_p7 = scmp.lt.s32.totalorder %s392_s12, %s392_s12 }
 0x10d   :  { %p399_p8 = por %p398_p7, %p397_p6 }
 0x10f   :  { %p400_p9 = pnand %p399_p8, %p393_p5 }
 0x111   :  { %403 = shalt.err (!%p400_p9)
}
 0x112   :  { %283 = dma.vmem_to_hbm [thread:$0]  %s281_s10, 32, %s667_s6, [#allocation5]  }
 0x113   :  { %412 = dma.done.wait [#allocation3], 32  }
 0x114   :  { %413 = vsyncadd [#allocation3], 4294967264 }
 0x115   :  { %414 = dma.done.wait [#allocation5], 32  }
 0x116   :  { %415 = vsyncadd [#allocation5], 4294967264 }
 0x117   :  { %290 = vsyncpa [#allocation3], 1 }
 0x118   :  { %291 = vsyncpa [#allocation5], 1 }

</bundles_post_ra>
